<compile_context>
chip_gen: v7x
topology: tpu7x:2x2x1
jax: 0.10.0
libtpu: 0.0.40
codegen_flags: <defaults>
</compile_context>

<pallas_src>
import jax
import jax.numpy as jnp
import numpy as np
from jax.experimental import pallas as pl
from jax.experimental.pallas import tpu as pltpu

# ---- synthetic module configuration (shapes follow the PyTorch __init__) ----
B, T = 2, 16                  # batch, sequence length
D_IN, P, D_OUT = 32, 32, 32   # linear_dim, proj_dim, affine output dim
LORDER, LSTRIDE = 5, 1        # left-context order / stride of the FSMN block
LC = (LORDER - 1) * LSTRIDE   # cache length carried between calls
# TODO(synk): rorder > 0 (conv_right look-ahead branch) not implemented; this
# kernel corresponds to the common rorder=0 (purely causal) FSMN configuration.
assert T >= LC and LSTRIDE == 1, "fixed-shape kernel assumes T >= LC, stride 1"

# packed-weight slab row offsets (every section starts on an 8-sublane boundary)
_r8 = lambda n: -(-n // 8) * 8
ROW_W1 = 0                          # w1^T  : rows [0, D_IN)
ROW_CONV = ROW_W1 + _r8(D_IN)       # taps  : rows [32, 32+LORDER)
ROW_W2 = ROW_CONV + _r8(LORDER)     # w2^T  : rows [40, 40+P)
ROW_B2 = ROW_W2 + _r8(P)            # b2    : row 72
WPACK_ROWS = ROW_B2 + 8             # 80
assert D_IN == P == D_OUT, "single packed slab assumes uniform channel width"

# scratch concat-slab layout (per batch): [pad(PRE) | cache(LC) | h(T)]
PRE = 8 - LC                        # 4  -> h starts on sublane 8 (aligned)
PAD_ROWS = _r8(PRE + LC + T)        # 24
OC_ROWS = 8                         # aligned out-cache window rows per batch


def _basic_block_kernel(x_ref, cache_ref, wpack_ref, y_ref, ocp_ref,
                        buf_ref, conv_ref):
    # Shapes (single program, everything resident in VMEM):
    #   x_ref      (B*T, D_IN)       batch folded into rows
    #   cache_ref  (B, LC, P)
    #   wpack_ref  (WPACK_ROWS, P)   packed [w1^T | conv taps | w2^T | b2]
    #   y_ref      (B*T, D_OUT)
    #   ocp_ref    (B*8, P)          padded out-cache (last LC rows of each 8-row
    #                                group are the new cache)
    #   buf_ref    (B, PAD_ROWS, P)  scratch: per-batch [pad | cache | h]
    #   conv_ref   (B*T, P)          scratch: FSMN outputs, batch-major, aligned
    w1t = wpack_ref[ROW_W1:ROW_W1 + D_IN, :]            # [D_IN, P]
    w2t = wpack_ref[ROW_W2:ROW_W2 + P, :]               # [P, D_OUT]
    b2 = wpack_ref[ROW_B2, :][None, :]                  # [1, D_OUT]
    taps = wpack_ref[ROW_CONV:ROW_CONV + LORDER, :]     # [LORDER, P]

    # Hoisted tap broadcasts (JAX does not CSE broadcast_in_dim, so do them
    # once here instead of LORDER*B times inside the loops).
    tap_bc = [jnp.broadcast_to(taps[k][None, :], (T, P))
              for k in range(LORDER - 1)]
    # last tap's window is h itself -> fuse with the residual add: h*(1+tap)
    scale_last = 1.0 + jnp.broadcast_to(taps[LORDER - 1][None, :], (T, P))

    # 1) LinearTransform (no bias): one MXU matmul over all B*T rows.
    h = jnp.dot(x_ref[...], w1t, preferred_element_type=jnp.float32)  # [B*T, P]

    # 2) FSMN memory block, unrolled over the (small, static) batch.
    for b in range(B):
        h_b = h[b * T:(b + 1) * T, :]                # aligned value slice (0/16)

        # stage [cache | h] into the padded scratch slab (h store is aligned)
        buf_ref[b, PRE:PRE + LC, :] = cache_ref[b]
        buf_ref[b, PRE + LC:PRE + LC + T, :] = h_b

        # out_cache: one aligned 8-row window; its last LC rows are the cache.
        ocp_ref[b * OC_ROWS:(b + 1) * OC_ROWS, :] = \
            buf_ref[b, PRE + LC + T - OC_ROWS:PRE + LC + T, :]

        # causal depthwise conv along time + residual (cross-correlation form)
        acc = h_b * scale_last
        for k in range(LORDER - 1):                  # static unrolled taps
            acc = acc + buf_ref[b, PRE + k:PRE + k + T, :] * tap_bc[k]
        conv_ref[b * T:(b + 1) * T, :] = acc         # aligned store (row 0/16)

    # 3) AffineTransform (+bias) and ReLU: one MXU matmul over all rows.
    z = jnp.dot(conv_ref[...], w2t, preferred_element_type=jnp.float32) + b2
    y_ref[...] = jnp.maximum(z, 0.0).astype(y_ref.dtype)


def pack_params(w1, wconv, w2, b2):
    """Pack all weights into one [WPACK_ROWS, P] slab (call ONCE, outside jit).
    w1: [P, D_IN], wconv: [P, 1, LORDER, 1], w2: [D_OUT, P], b2: [D_OUT]."""
    w1t = jnp.transpose(w1)                      # [D_IN, P]
    taps = jnp.transpose(wconv[:, 0, :, 0])      # [LORDER, P]
    w2t = jnp.transpose(w2)                      # [P, D_OUT]
    b2r = b2.reshape(1, D_OUT)

    def pad_rows(a, rows):
        return jnp.pad(a, ((0, rows - a.shape[0]), (0, 0)))

    return jnp.concatenate([
        pad_rows(w1t, ROW_CONV - ROW_W1),
        pad_rows(taps, ROW_W2 - ROW_CONV),
        pad_rows(w2t, ROW_B2 - ROW_W2),
        pad_rows(b2r, WPACK_ROWS - ROW_B2),
    ], axis=0).astype(jnp.float32)


@jax.jit
def basic_block_forward(x, in_cache, wpack):
    """x: [B,T,D_IN] f32, in_cache: [B,P,LC,1] f32 (PyTorch layouts),
    wpack: [WPACK_ROWS, P] packed weights from pack_params."""
    x_flat = x.reshape(B * T, D_IN)                            # free reshape
    cache_btp = jnp.transpose(in_cache[..., 0], (0, 2, 1))     # [B, LC, P]

    flops = 2 * (B * T) * D_IN * P + 2 * (B * T) * P * D_OUT \
        + 2 * B * T * P * LORDER
    bytes_accessed = 4 * (B * T * D_IN + B * LC * P + WPACK_ROWS * P
                          + B * T * D_OUT + B * OC_ROWS * P)

    y_flat, oc_pad = pl.pallas_call(
        _basic_block_kernel,
        out_shape=(jax.ShapeDtypeStruct((B * T, D_OUT), x.dtype),
                   jax.ShapeDtypeStruct((B * OC_ROWS, P), x.dtype)),
        in_specs=[
            pl.BlockSpec(memory_space=pltpu.MemorySpace.VMEM),
            pl.BlockSpec(memory_space=pltpu.MemorySpace.VMEM),
            pl.BlockSpec(memory_space=pltpu.MemorySpace.VMEM),
        ],
        out_specs=(
            pl.BlockSpec(memory_space=pltpu.MemorySpace.VMEM),
            pl.BlockSpec(memory_space=pltpu.MemorySpace.VMEM),
        ),
        scratch_shapes=[
            pltpu.VMEM((B, PAD_ROWS, P), jnp.float32),   # [pad|cache|h] slab
            pltpu.VMEM((B * T, P), jnp.float32),         # FSMN output rows
        ],
        cost_estimate=pl.CostEstimate(flops=flops, transcendentals=0,
                                      bytes_accessed=bytes_accessed),
    )(x_flat, cache_btp, wpack)

    y = y_flat.reshape(B, T, D_OUT)
    new_cache = oc_pad.reshape(B, OC_ROWS, P)[:, OC_ROWS - LC:, :]  # [B, LC, P]
    out_cache = jnp.transpose(new_cache, (0, 2, 1))[..., None]      # [B,P,LC,1]
    return y, out_cache


def _reference(x, in_cache, w1, wconv, w2, b2):
    """Pure-JAX reference mirroring the PyTorch forward."""
    h = jnp.einsum('btd,pd->btp', x, w1)                       # linear, no bias
    cache = jnp.transpose(in_cache[..., 0], (0, 2, 1))         # [B, LC, P]
    y_full = jnp.concatenate([cache, h], axis=1)               # [B, LC+T, P]
    out_cache = y_full[:, T:T + LC, :]
    taps = wconv[:, 0, :, 0]                                   # [P, LORDER]
    conv = jnp.zeros_like(h)
    for k in range(LORDER):
        conv = conv + y_full[:, k * LSTRIDE:k * LSTRIDE + T, :] * taps[:, k][None, None, :]
    out = h + conv
    z = jnp.einsum('btp,op->bto', out, w2) + b2[None, None, :]
    y = jnp.maximum(z, 0.0)
    return y, jnp.transpose(out_cache, (0, 2, 1))[..., None]


if __name__ == "__main__":
    key = jax.random.PRNGKey(0)
    k_x, k_c, k_w1, k_wc, k_w2, k_b2 = jax.random.split(key, 6)

    x = jax.random.normal(k_x, (B, T, D_IN), jnp.float32)
    in_cache = jax.random.normal(k_c, (B, P, LC, 1), jnp.float32)
    w1 = jax.random.normal(k_w1, (P, D_IN), jnp.float32) * 0.1          # Linear(D_IN, P, bias=False)
    wconv = jax.random.normal(k_wc, (P, 1, LORDER, 1), jnp.float32) * 0.1  # Conv2d depthwise
    w2 = jax.random.normal(k_w2, (D_OUT, P), jnp.float32) * 0.1         # Linear(P, D_OUT)
    b2 = jax.random.normal(k_b2, (D_OUT,), jnp.float32) * 0.1

    wpack = pack_params(w1, wconv, w2, b2)       # one-time weight packing
    y, out_cache = basic_block_forward(x, in_cache, wpack)
    jax.block_until_ready((y, out_cache))

    y_ref, cache_ref = _reference(x, in_cache, w1, wconv, w2, b2)
    np.testing.assert_allclose(np.asarray(y), np.asarray(y_ref), rtol=1e-5, atol=1e-5)
    np.testing.assert_allclose(np.asarray(out_cache), np.asarray(cache_ref), rtol=1e-5, atol=1e-5)

    print("KERNEL_OK")
</pallas_src>

<mosaic_0001>
module attributes {stable_mosaic.version = 11 : i64} {
  func.func @_basic_block_kernel(%arg0: memref<32x32xf32, #tpu.memory_space<vmem>>, %arg1: memref<2x4x32xf32, #tpu.memory_space<vmem>>, %arg2: memref<80x32xf32, #tpu.memory_space<vmem>>, %arg3: memref<32x32xf32, #tpu.memory_space<vmem>>, %arg4: memref<16x32xf32, #tpu.memory_space<vmem>>, %arg5: memref<2x24x32xf32, #tpu.memory_space<vmem>>, %arg6: memref<32x32xf32, #tpu.memory_space<vmem>>) attributes {dimension_semantics = [], scalar_prefetch = 0 : i64, scratch_operands = 2 : i64, tpu.core_type = #tpu.core_type<tc>} {
    %c0 = arith.constant 0 : index
    %c0_0 = arith.constant 0 : index
    %0 = vector.load %arg2[%c0, %c0_0] : memref<80x32xf32, #tpu.memory_space<vmem>>, vector<32x32xf32>
    %c40 = arith.constant 40 : index
    %c0_1 = arith.constant 0 : index
    %1 = vector.load %arg2[%c40, %c0_1] : memref<80x32xf32, #tpu.memory_space<vmem>>, vector<32x32xf32>
    %c72 = arith.constant 72 : index
    %c0_2 = arith.constant 0 : index
    %2 = vector.load %arg2[%c72, %c0_2] : memref<80x32xf32, #tpu.memory_space<vmem>>, vector<1x32xf32>
    %3 = vector.shape_cast %2 : vector<1x32xf32> to vector<32xf32>
    %4 = vector.shape_cast %3 : vector<32xf32> to vector<1x32xf32>
    %c32 = arith.constant 32 : index
    %c0_3 = arith.constant 0 : index
    %5 = vector.load %arg2[%c32, %c0_3] : memref<80x32xf32, #tpu.memory_space<vmem>>, vector<5x32xf32>
    %6 = vector.extract_strided_slice %5 {offsets = [0, 0], sizes = [1, 32], strides = [1, 1]} : vector<5x32xf32> to vector<1x32xf32>
    %7 = vector.shape_cast %6 : vector<1x32xf32> to vector<32xf32>
    %8 = vector.shape_cast %7 : vector<32xf32> to vector<1x32xf32>
    %9 = vector.shape_cast %8 : vector<1x32xf32> to vector<1x32xf32>
    %10 = vector.broadcast %9 : vector<1x32xf32> to vector<16x32xf32>
    %11 = vector.extract_strided_slice %5 {offsets = [1, 0], sizes = [1, 32], strides = [1, 1]} : vector<5x32xf32> to vector<1x32xf32>
    %12 = vector.shape_cast %11 : vector<1x32xf32> to vector<32xf32>
    %13 = vector.shape_cast %12 : vector<32xf32> to vector<1x32xf32>
    %14 = vector.shape_cast %13 : vector<1x32xf32> to vector<1x32xf32>
    %15 = vector.broadcast %14 : vector<1x32xf32> to vector<16x32xf32>
    %16 = vector.extract_strided_slice %5 {offsets = [2, 0], sizes = [1, 32], strides = [1, 1]} : vector<5x32xf32> to vector<1x32xf32>
    %17 = vector.shape_cast %16 : vector<1x32xf32> to vector<32xf32>
    %18 = vector.shape_cast %17 : vector<32xf32> to vector<1x32xf32>
    %19 = vector.shape_cast %18 : vector<1x32xf32> to vector<1x32xf32>
    %20 = vector.broadcast %19 : vector<1x32xf32> to vector<16x32xf32>
    %21 = vector.extract_strided_slice %5 {offsets = [3, 0], sizes = [1, 32], strides = [1, 1]} : vector<5x32xf32> to vector<1x32xf32>
    %22 = vector.shape_cast %21 : vector<1x32xf32> to vector<32xf32>
    %23 = vector.shape_cast %22 : vector<32xf32> to vector<1x32xf32>
    %24 = vector.shape_cast %23 : vector<1x32xf32> to vector<1x32xf32>
    %25 = vector.broadcast %24 : vector<1x32xf32> to vector<16x32xf32>
    %26 = vector.extract_strided_slice %5 {offsets = [4, 0], sizes = [1, 32], strides = [1, 1]} : vector<5x32xf32> to vector<1x32xf32>
    %27 = vector.shape_cast %26 : vector<1x32xf32> to vector<32xf32>
    %28 = vector.shape_cast %27 : vector<32xf32> to vector<1x32xf32>
    %29 = vector.shape_cast %28 : vector<1x32xf32> to vector<1x32xf32>
    %30 = vector.broadcast %29 : vector<1x32xf32> to vector<16x32xf32>
    %cst = arith.constant 1.000000e+00 : f32
    %31 = vector.broadcast %cst : f32 to vector<16x32xf32>
    %32 = arith.addf %31, %30 : vector<16x32xf32>
    %c0_4 = arith.constant 0 : index
    %c0_5 = arith.constant 0 : index
    %33 = vector.load %arg0[%c0_4, %c0_5] : memref<32x32xf32, #tpu.memory_space<vmem>>, vector<32x32xf32>
    %cst_6 = arith.constant dense<0.000000e+00> : vector<32x32xf32>
    %34 = tpu.matmul %33, %0, %cst_6 {dimension_numbers = #tpu.dot_dimension_numbers<[1], [0], [0], [1], [0, 0, 1, 1], [], []>} : vector<32x32xf32>, vector<32x32xf32>, vector<32x32xf32> -> vector<32x32xf32>
    %35 = vector.extract_strided_slice %34 {offsets = [0, 0], sizes = [16, 32], strides = [1, 1]} : vector<32x32xf32> to vector<16x32xf32>
    %c0_7 = arith.constant 0 : index
    %c0_8 = arith.constant 0 : index
    %c0_9 = arith.constant 0 : index
    %36 = vector.load %arg1[%c0_7, %c0_8, %c0_9] : memref<2x4x32xf32, #tpu.memory_space<vmem>>, vector<1x4x32xf32>
    %37 = vector.shape_cast %36 : vector<1x4x32xf32> to vector<4x32xf32>
    %c0_10 = arith.constant 0 : index
    %c4 = arith.constant 4 : index
    %c0_11 = arith.constant 0 : index
    %38 = vector.load %arg5[%c0_10, %c4, %c0_11] : memref<2x24x32xf32, #tpu.memory_space<vmem>>, vector<1x4x32xf32>
    %39 = vector.shape_cast %38 : vector<1x4x32xf32> to vector<4x32xf32>
    %40 = vector.shape_cast %37 : vector<4x32xf32> to vector<1x4x32xf32>
    tpu.vector_store %arg5[%c0_10, %c4, %c0_11], %40 {strides = array<i32>} : memref<2x24x32xf32, #tpu.memory_space<vmem>>, vector<1x4x32xf32>,
    %c0_12 = arith.constant 0 : index
    %c8 = arith.constant 8 : index
    %c0_13 = arith.constant 0 : index
    %41 = vector.load %arg5[%c0_12, %c8, %c0_13] : memref<2x24x32xf32, #tpu.memory_space<vmem>>, vector<1x16x32xf32>
    %42 = vector.shape_cast %41 : vector<1x16x32xf32> to vector<16x32xf32>
    %43 = vector.shape_cast %35 : vector<16x32xf32> to vector<1x16x32xf32>
    tpu.vector_store %arg5[%c0_12, %c8, %c0_13], %43 {strides = array<i32>} : memref<2x24x32xf32, #tpu.memory_space<vmem>>, vector<1x16x32xf32>,
    %c0_14 = arith.constant 0 : index
    %c16 = arith.constant 16 : index
    %c0_15 = arith.constant 0 : index
    %44 = vector.load %arg5[%c0_14, %c16, %c0_15] : memref<2x24x32xf32, #tpu.memory_space<vmem>>, vector<1x8x32xf32>
    %45 = vector.shape_cast %44 : vector<1x8x32xf32> to vector<8x32xf32>
    %c0_16 = arith.constant 0 : index
    %c0_17 = arith.constant 0 : index
    %46 = vector.load %arg4[%c0_16, %c0_17] : memref<16x32xf32, #tpu.memory_space<vmem>>, vector<8x32xf32>
    tpu.vector_store %arg4[%c0_16, %c0_17], %45 {strides = array<i32>} : memref<16x32xf32, #tpu.memory_space<vmem>>, vector<8x32xf32>,
    %47 = arith.mulf %35, %32 : vector<16x32xf32>
    %c0_18 = arith.constant 0 : index
    %c4_19 = arith.constant 4 : index
    %c0_20 = arith.constant 0 : index
    %48 = vector.load %arg5[%c0_18, %c4_19, %c0_20] : memref<2x24x32xf32, #tpu.memory_space<vmem>>, vector<1x16x32xf32>
    %49 = vector.shape_cast %48 : vector<1x16x32xf32> to vector<16x32xf32>
    %50 = arith.mulf %49, %10 : vector<16x32xf32>
    %51 = arith.addf %47, %50 : vector<16x32xf32>
    %c0_21 = arith.constant 0 : index
    %c5 = arith.constant 5 : index
    %c0_22 = arith.constant 0 : index
    %52 = vector.load %arg5[%c0_21, %c5, %c0_22] : memref<2x24x32xf32, #tpu.memory_space<vmem>>, vector<1x16x32xf32>
    %53 = vector.shape_cast %52 : vector<1x16x32xf32> to vector<16x32xf32>
    %54 = arith.mulf %53, %15 : vector<16x32xf32>
    %55 = arith.addf %51, %54 : vector<16x32xf32>
    %c0_23 = arith.constant 0 : index
    %c6 = arith.constant 6 : index
    %c0_24 = arith.constant 0 : index
    %56 = vector.load %arg5[%c0_23, %c6, %c0_24] : memref<2x24x32xf32, #tpu.memory_space<vmem>>, vector<1x16x32xf32>
    %57 = vector.shape_cast %56 : vector<1x16x32xf32> to vector<16x32xf32>
    %58 = arith.mulf %57, %20 : vector<16x32xf32>
    %59 = arith.addf %55, %58 : vector<16x32xf32>
    %c0_25 = arith.constant 0 : index
    %c7 = arith.constant 7 : index
    %c0_26 = arith.constant 0 : index
    %60 = vector.load %arg5[%c0_25, %c7, %c0_26] : memref<2x24x32xf32, #tpu.memory_space<vmem>>, vector<1x16x32xf32>
    %61 = vector.shape_cast %60 : vector<1x16x32xf32> to vector<16x32xf32>
    %62 = arith.mulf %61, %25 : vector<16x32xf32>
    %63 = arith.addf %59, %62 : vector<16x32xf32>
    %c0_27 = arith.constant 0 : index
    %c0_28 = arith.constant 0 : index
    %64 = vector.load %arg6[%c0_27, %c0_28] : memref<32x32xf32, #tpu.memory_space<vmem>>, vector<16x32xf32>
    tpu.vector_store %arg6[%c0_27, %c0_28], %63 {strides = array<i32>} : memref<32x32xf32, #tpu.memory_space<vmem>>, vector<16x32xf32>,
    %65 = vector.extract_strided_slice %34 {offsets = [16, 0], sizes = [16, 32], strides = [1, 1]} : vector<32x32xf32> to vector<16x32xf32>
    %c1 = arith.constant 1 : index
    %c0_29 = arith.constant 0 : index
    %c0_30 = arith.constant 0 : index
    %66 = vector.load %arg1[%c1, %c0_29, %c0_30] : memref<2x4x32xf32, #tpu.memory_space<vmem>>, vector<1x4x32xf32>
    %67 = vector.shape_cast %66 : vector<1x4x32xf32> to vector<4x32xf32>
    %c1_31 = arith.constant 1 : index
    %c4_32 = arith.constant 4 : index
    %c0_33 = arith.constant 0 : index
    %68 = vector.load %arg5[%c1_31, %c4_32, %c0_33] : memref<2x24x32xf32, #tpu.memory_space<vmem>>, vector<1x4x32xf32>
    %69 = vector.shape_cast %68 : vector<1x4x32xf32> to vector<4x32xf32>
    %70 = vector.shape_cast %67 : vector<4x32xf32> to vector<1x4x32xf32>
    tpu.vector_store %arg5[%c1_31, %c4_32, %c0_33], %70 {strides = array<i32>} : memref<2x24x32xf32, #tpu.memory_space<vmem>>, vector<1x4x32xf32>,
    %c1_34 = arith.constant 1 : index
    %c8_35 = arith.constant 8 : index
    %c0_36 = arith.constant 0 : index
    %71 = vector.load %arg5[%c1_34, %c8_35, %c0_36] : memref<2x24x32xf32, #tpu.memory_space<vmem>>, vector<1x16x32xf32>
    %72 = vector.shape_cast %71 : vector<1x16x32xf32> to vector<16x32xf32>
    %73 = vector.shape_cast %65 : vector<16x32xf32> to vector<1x16x32xf32>
    tpu.vector_store %arg5[%c1_34, %c8_35, %c0_36], %73 {strides = array<i32>} : memref<2x24x32xf32, #tpu.memory_space<vmem>>, vector<1x16x32xf32>,
    %c1_37 = arith.constant 1 : index
    %c16_38 = arith.constant 16 : index
    %c0_39 = arith.constant 0 : index
    %74 = vector.load %arg5[%c1_37, %c16_38, %c0_39] : memref<2x24x32xf32, #tpu.memory_space<vmem>>, vector<1x8x32xf32>
    %75 = vector.shape_cast %74 : vector<1x8x32xf32> to vector<8x32xf32>
    %c8_40 = arith.constant 8 : index
    %c0_41 = arith.constant 0 : index
    %76 = vector.load %arg4[%c8_40, %c0_41] : memref<16x32xf32, #tpu.memory_space<vmem>>, vector<8x32xf32>
    tpu.vector_store %arg4[%c8_40, %c0_41], %75 {strides = array<i32>} : memref<16x32xf32, #tpu.memory_space<vmem>>, vector<8x32xf32>,
    %77 = arith.mulf %65, %32 : vector<16x32xf32>
    %c1_42 = arith.constant 1 : index
    %c4_43 = arith.constant 4 : index
    %c0_44 = arith.constant 0 : index
    %78 = vector.load %arg5[%c1_42, %c4_43, %c0_44] : memref<2x24x32xf32, #tpu.memory_space<vmem>>, vector<1x16x32xf32>
    %79 = vector.shape_cast %78 : vector<1x16x32xf32> to vector<16x32xf32>
    %80 = arith.mulf %79, %10 : vector<16x32xf32>
    %81 = arith.addf %77, %80 : vector<16x32xf32>
    %c1_45 = arith.constant 1 : index
    %c5_46 = arith.constant 5 : index
    %c0_47 = arith.constant 0 : index
    %82 = vector.load %arg5[%c1_45, %c5_46, %c0_47] : memref<2x24x32xf32, #tpu.memory_space<vmem>>, vector<1x16x32xf32>
    %83 = vector.shape_cast %82 : vector<1x16x32xf32> to vector<16x32xf32>
    %84 = arith.mulf %83, %15 : vector<16x32xf32>
    %85 = arith.addf %81, %84 : vector<16x32xf32>
    %c1_48 = arith.constant 1 : index
    %c6_49 = arith.constant 6 : index
    %c0_50 = arith.constant 0 : index
    %86 = vector.load %arg5[%c1_48, %c6_49, %c0_50] : memref<2x24x32xf32, #tpu.memory_space<vmem>>, vector<1x16x32xf32>
    %87 = vector.shape_cast %86 : vector<1x16x32xf32> to vector<16x32xf32>
    %88 = arith.mulf %87, %20 : vector<16x32xf32>
    %89 = arith.addf %85, %88 : vector<16x32xf32>
    %c1_51 = arith.constant 1 : index
    %c7_52 = arith.constant 7 : index
    %c0_53 = arith.constant 0 : index
    %90 = vector.load %arg5[%c1_51, %c7_52, %c0_53] : memref<2x24x32xf32, #tpu.memory_space<vmem>>, vector<1x16x32xf32>
    %91 = vector.shape_cast %90 : vector<1x16x32xf32> to vector<16x32xf32>
    %92 = arith.mulf %91, %25 : vector<16x32xf32>
    %93 = arith.addf %89, %92 : vector<16x32xf32>
    %c16_54 = arith.constant 16 : index
    %c0_55 = arith.constant 0 : index
    %94 = vector.load %arg6[%c16_54, %c0_55] : memref<32x32xf32, #tpu.memory_space<vmem>>, vector<16x32xf32>
    tpu.vector_store %arg6[%c16_54, %c0_55], %93 {strides = array<i32>} : memref<32x32xf32, #tpu.memory_space<vmem>>, vector<16x32xf32>,
    %c0_56 = arith.constant 0 : index
    %c0_57 = arith.constant 0 : index
    %95 = vector.load %arg6[%c0_56, %c0_57] : memref<32x32xf32, #tpu.memory_space<vmem>>, vector<32x32xf32>
    %cst_58 = arith.constant dense<0.000000e+00> : vector<32x32xf32>
    %96 = tpu.matmul %95, %1, %cst_58 {dimension_numbers = #tpu.dot_dimension_numbers<[1], [0], [0], [1], [0, 0, 1, 1], [], []>} : vector<32x32xf32>, vector<32x32xf32>, vector<32x32xf32> -> vector<32x32xf32>
    %97 = vector.broadcast %4 : vector<1x32xf32> to vector<32x32xf32>
    %98 = arith.addf %96, %97 : vector<32x32xf32>
    %cst_59 = arith.constant 0.000000e+00 : f32
    %99 = vector.broadcast %cst_59 : f32 to vector<32x32xf32>
    %100 = arith.maximumf %98, %99 : vector<32x32xf32>
    %c0_60 = arith.constant 0 : index
    %c0_61 = arith.constant 0 : index
    %101 = vector.load %arg3[%c0_60, %c0_61] : memref<32x32xf32, #tpu.memory_space<vmem>>, vector<32x32xf32>
    tpu.vector_store %arg3[%c0_60, %c0_61], %100 {strides = array<i32>} : memref<32x32xf32, #tpu.memory_space<vmem>>, vector<32x32xf32>,
    return
  }
}

</mosaic_0001>

<bundles_post_ra>
// kernel: basic_block_forward.1
= control target key start
LH: loop header
LB: loop body
LE: loop exit
PB: predicated region body
PF: predicated region fallthrough
CT: control target
= control target key end

     0   :  { %vm52_vm0 = vcmask 261120   ;;  %s567_s0 = inlined_call_operand.vmem [shape: f32[32,32], index: 0, kind: input, shape index: {}]   ;;  %s568_s1 = inlined_call_operand.vmem [shape: f32[2,4,32], index: 1, kind: input, shape index: {}]   ;;  %s569_s2 = inlined_call_operand.vmem [shape: f32[80,32], index: 2, kind: input, shape index: {}]   ;;  %s570_s3 = inlined_call_operand.hbm [shape: f32[32,32], index: 3, kind: output, shape index: {0}]   ;;  %s571_s4 = inlined_call_operand.vmem [shape: f32[16,32], index: 4, kind: output, shape index: {1}]  }
   0x1   :  { %v17_v0 = vld [vmem:[%s569_s2] sm:$0xff]  ;;  %v18_v1 = vld [vmem:[%s569_s2 + $0x8] sm:$0xff]  ;;  %v19_v2 = vld [vmem:[%s569_s2 + $0x10] sm:$0xff] }
   0x2   :  { %v408_v3 = vpack.c.bf16 %v18_v1, %v17_v0  ;;  %v20_v4 = vld [vmem:[%s569_s2 + $0x18] sm:$0xff]  ;;  %v48_v5 = vld [vmem:[%s567_s0] sm:$0xff] }
   0x3   :  { %v412_v6 = vpack.c.bf16 %v20_v4, %v19_v2  ;;  %388 = vmatprep.mubr.msk.f32.mxu0 %vm52_vm0, %v48_v5 }
   0x4   :  { %409 = vmatprep.subr.bf16.mxu0 %v408_v3 }
   0x5   :  { %10 = vsyncpa [#allocation5], 0  ;;  %411 = vmatpush3.bf16.msra.mxu0 %v408_v3  ;;  %v49_v7 = vld [vmem:[%s567_s0 + $0x8] sm:$0xff]  ;;  %v50_v8 = vld [vmem:[%s567_s0 + $0x10] sm:$0xff]  ;;  %vm151_vm1 = vcmask 257024   ;;  %v27_v18 = vlaneseq  ;;  %s451_s22 = smov [#allocation4]  }
   0x6   :  { %413 = vmatprep.subr.bf16.mxu0 %v412_v6  ;;  %v51_v9 = vld [vmem:[%s567_s0 + $0x18] sm:$0xff]  ;;  %v150_v10 = vld [vmem:[%s568_s1] sm:$0xf]  ;;  %v358_v11 = vld [vmem:[%s568_s1 + $0x4] sm:$0xf]  ;;  %s339_s23 = sshll.u32 %s451_s22, 4  ;;  %s340_s23 = int_to_ptr.vmem [resolvable:$true] %s339_s23 }
   0x7   :  { %152 = vst.msk [vmem:[#allocation2 + $0x4] sm:$0xf] %vm151_vm1, %v150_v10  ;;  %188 = vst.msk [vmem:[#allocation2 + $0x1c] sm:$0xf] %vm151_vm1, %v358_v11  ;;  %v21_v12 = vld [vmem:[%s569_s2 + $0x28] sm:$0xff]  ;;  %v22_v13 = vld [vmem:[%s569_s2 + $0x30] sm:$0xff]  ;;  %p432_p1 = scmp.lt.s32.totalorder %s340_s23, %s340_s23 }
   0x8   :  { %v416_v14 = vpack.c.bf16 %v22_v13, %v21_v12  ;;  %v23_v15 = vld [vmem:[%s569_s2 + $0x38] sm:$0xff]  ;;  %v24_v16 = vld [vmem:[%s569_s2 + $0x40] sm:$0xff]  ;;  %v28_v19 = vshrl.u32 %v27_v18, 7 }
   0x9   :  { %415 = vmatpush3.bf16.msra.mxu0 %v412_v6  ;;  %v420_v17 = vpack.c.bf16 %v24_v16, %v23_v15  ;;  %v26_v21 = vld [vmem:[%s569_s2 + $0x20] sm:$0x1f] }
   0xa   :  { %417 = vmatprep.subr.bf16.mxu1 %v416_v14  ;;  %v45_v20 = vsub.s32 4, %v28_v19  ;;  %v29_v25 = vsub.s32 0, %v28_v19  ;;  %v33_v26 = vsub.s32 1, %v28_v19  ;;  %v37_v28 = vsub.s32 2, %v28_v19 }
   0xb   :  { %419 = vmatpush3.bf16.msra.mxu1 %v416_v14  ;;  %v41_v32 = vsub.s32 3, %v28_v19 }
   0xc   :  { %389 = vmatmul.mubr.msk.f32.vlgmr.msra.gmra.mrb[0].mxu0 %vm52_vm0, %v49_v7  ;;  %421 = vmatprep.subr.bf16.mxu1 %v420_v17  ;;  %v46_v24 = vrot.slane %v26_v21, %v45_v20  ;;  %v30_v31 = vrot.slane %v26_v21, %v29_v25  ;;  %v34_v34 = vrot.slane %v26_v21, %v33_v26 }
   0xd   :  { %391 = vmatprep.mubr.msk.f32.mxu0 %vm52_vm0, %v50_v8  ;;  %v38_v35 = vrot.slane %v26_v21, %v37_v28  ;;  %v42_v46 = vrot.slane %v26_v21, %v41_v32 }
   0xe   :  { %v47_v30 = vadd.f32 1.0, %v46_v24 }
   0xf   :  { %423 = vmatpush3.bf16.msra.mxu1 %v420_v17 }
  0x10   :  { %392 = vmatmul.mubr.msk.f32.gmra.mrb[2].mxu0 %vm52_vm0, %v51_v9 }
  0xdf   :  { %v390_v22 = vpop.f32.mrb[0].mxu0 }
  0xe0   :  { %154 = vst.msk [vmem:[#allocation2 + $0x10] sm:$0xff] %vm52_vm0, %v390_v22  ;;  %v131_v23 = vpop.f32.mrb[1].mxu0  ;;  %v158_v39 = vmul.f32 %v390_v22, %v47_v30 }
  0xe1   :  { %153 = vst.msk [vmem:[#allocation2 + $0x8] sm:$0xff] %vm52_vm0, %v131_v23  ;;  %v157_v40 = vmul.f32 %v131_v23, %v47_v30 }
  0xe3   :  { %v393_v27 = vpop.f32.mrb[2].mxu0 }
  0xe4   :  { %190 = vst.msk [vmem:[#allocation2 + $0x28] sm:$0xff] %vm52_vm0, %v393_v27  ;;  %v141_v29 = vpop.f32.mrb[3].mxu0  ;;  %v194_v56 = vmul.f32 %v393_v27, %v47_v30 }
  0xe5   :  { %189 = vst.msk [vmem:[#allocation2 + $0x20] sm:$0xff] %vm52_vm0, %v141_v29  ;;  %v193_v57 = vmul.f32 %v141_v29, %v47_v30  ;;  %v359_v30 = vld [vmem:[%s569_s2 + $0x48] ss:$0 sm:$0xff]  ;;  %s427_s2 = scalar_lea.vmem %s340_s23, 512 }
  0xe6   :  { %p428_p0 = scmp.ne.s32.totalorder %s340_s23, %s427_s2  ;;  %p433_p2 = scmp.lt.s32.totalorder %s427_s2, %s427_s2 }
  0xe7   :  { %v155_v33 = vld [vmem:[#allocation2 + $0x10] sm:$0xff] }
  0xe8   :  { %156 = vst.msk [vmem:[%s571_s4] sm:$0xff] %vm52_vm0, %v155_v33  ;;  %v159_v36 = vld [vmem:[#allocation2 + $0x4] sm:$0xff]  ;;  %v160_v37 = vld [vmem:[#allocation2 + $0xc] sm:$0xff]  ;;  %p434_p3 = por %p433_p2, %p432_p1 }
  0xe9   :  { %v165_v38 = vld [vmem:[#allocation2 + $0x5] sm:$0xff]  ;;  %v161_v41 = vmul.f32 %v159_v36, %v30_v31  ;;  %v162_v42 = vmul.f32 %v160_v37, %v30_v31  ;;  %v166_v43 = vld [vmem:[#allocation2 + $0xd] sm:$0xff] }
  0xea   :  { %v171_v44 = vld [vmem:[#allocation2 + $0x6] sm:$0xff]  ;;  %v172_v45 = vld [vmem:[#allocation2 + $0xe] sm:$0xff]  ;;  %v167_v49 = vmul.f32 %v165_v38, %v34_v34  ;;  %v168_v50 = vmul.f32 %v166_v43, %v34_v34  ;;  %p435_p4 = pnand %p434_p3, %p428_p0 }
  0xeb   :  { %v163_v47 = vadd.f32 %v161_v41, %v157_v40  ;;  %v164_v48 = vadd.f32 %v162_v42, %v158_v39  ;;  %v177_v51 = vld [vmem:[#allocation2 + $0x7] sm:$0xff]  ;;  %v178_v52 = vld [vmem:[#allocation2 + $0xf] sm:$0xff]  ;;  %v173_v54 = vmul.f32 %v171_v44, %v38_v35  ;;  %v174_v55 = vmul.f32 %v172_v45, %v38_v35 }
  0xec   :  { %v191_v53 = vld [vmem:[#allocation2 + $0x28] sm:$0xff]  ;;  %v195_v58 = vld [vmem:[#allocation2 + $0x1c] sm:$0xff]  ;;  %v179_v4 = vmul.f32 %v177_v51, %v42_v46  ;;  %v180_v5 = vmul.f32 %v178_v52, %v42_v46 }
  0xed   :  { %192 = vst.msk [vmem:[%s571_s4 + $0x8] sm:$0xff] %vm52_vm0, %v191_v53  ;;  %v196_v59 = vld [vmem:[#allocation2 + $0x24] sm:$0xff]  ;;  %v169_v61 = vadd.f32 %v167_v49, %v163_v47  ;;  %v170_v62 = vadd.f32 %v168_v50, %v164_v48  ;;  %v197_v63 = vmul.f32 %v195_v58, %v30_v31 }
  0xee   :  { %v201_v60 = vld [vmem:[#allocation2 + $0x1d] sm:$0xff]  ;;  %v198_v0 = vmul.f32 %v196_v59, %v30_v31  ;;  %v202_v1 = vld [vmem:[#allocation2 + $0x25] sm:$0xff] }
  0xef   :  { %v207_v2 = vld [vmem:[#allocation2 + $0x1e] sm:$0xff]  ;;  %v208_v3 = vld [vmem:[#allocation2 + $0x26] sm:$0xff]  ;;  %v203_v6 = vmul.f32 %v201_v60, %v34_v34  ;;  %v204_v7 = vmul.f32 %v202_v1, %v34_v34  ;;  %v175_v8 = vadd.f32 %v173_v54, %v169_v61  ;;  %v176_v9 = vadd.f32 %v174_v55, %v170_v62 }
  0xf0   :  { %v199_v10 = vadd.f32 %v197_v63, %v193_v57  ;;  %v200_v11 = vadd.f32 %v198_v0, %v194_v56  ;;  %v209_v12 = vmul.f32 %v207_v2, %v38_v35  ;;  %v210_v13 = vmul.f32 %v208_v3, %v38_v35  ;;  %v213_v14 = vld [vmem:[#allocation2 + $0x1f] sm:$0xff]  ;;  %v214_v15 = vld [vmem:[#allocation2 + $0x27] sm:$0xff] }
  0xf1   :  { %v181_v16 = vadd.f32 %v179_v4, %v175_v8  ;;  %v182_v17 = vadd.f32 %v180_v5, %v176_v9  ;;  %v215_v22 = vmul.f32 %v213_v14, %v42_v46  ;;  %v216_v23 = vmul.f32 %v214_v15, %v42_v46 }
  0xf2   :  { %v205_v18 = vadd.f32 %v203_v6, %v199_v10  ;;  %v206_v19 = vadd.f32 %v204_v7, %v200_v11 }
  0xf3   :  { %183 = vst.msk [vmem:[#allocation3] sm:$0xff] %vm52_vm0, %v181_v16  ;;  %184 = vst.msk [vmem:[#allocation3 + $0x8] sm:$0xff] %vm52_vm0, %v182_v17 }
  0xf4   :  { %v211_v20 = vadd.f32 %v209_v12, %v205_v18  ;;  %v212_v21 = vadd.f32 %v210_v13, %v206_v19 }
  0xf6   :  { %v217_v24 = vadd.f32 %v215_v22, %v211_v20  ;;  %v218_v25 = vadd.f32 %v216_v23, %v212_v21 }
  0xf8   :  { %219 = vst.msk [vmem:[#allocation3 + $0x10] sm:$0xff] %vm52_vm0, %v217_v24  ;;  %220 = vst.msk [vmem:[#allocation3 + $0x18] sm:$0xff] %vm52_vm0, %v218_v25 }
  0xfa   :  { %v221_v26 = vld [vmem:[#allocation3] sm:$0xff]  ;;  %v222_v27 = vld [vmem:[#allocation3 + $0x8] sm:$0xff] }
  0xfb   :  { %402 = vmatprep.mubr.msk.f32.mxu1 %vm52_vm0, %v221_v26 }
  0xfc   :  { %403 = vmatmul.mubr.msk.f32.vlgmr.msra.gmra.mrb[0].mxu1 %vm52_vm0, %v222_v27 }
  0xff   :  { %v223_v28 = vld [vmem:[#allocation3 + $0x10] sm:$0xff]  ;;  %v224_v29 = vld [vmem:[#allocation3 + $0x18] sm:$0xff] }
 0x100   :  { %405 = vmatprep.mubr.msk.f32.mxu1 %vm52_vm0, %v223_v28 }
 0x101   :  { %406 = vmatmul.mubr.msk.f32.gmra.mrb[2].mxu1 %vm52_vm0, %v224_v29 }
 0x1cf   :  { %v404_v31 = vpop.f32.mrb[0].mxu1 }
 0x1d0   :  { %v313_v32 = vadd.f32 %v404_v31, %v359_v30  ;;  %v307_v33 = vpop.f32.mrb[1].mxu1 }
 0x1d1   :  { %v308_v34 = vadd.f32 %v359_v30, %v307_v33 }
 0x1d2   :  { %v327_v35 = vmax.f32 %v313_v32, 0.0 }
 0x1d3   :  { %v326_v36 = vmax.f32 %v308_v34, 0.0 }
 0x1d4   :  { %v407_v37 = vpop.f32.mrb[2].mxu1  ;;  %331 = vst.msk [vmem:[#allocation4 + $0x8] sm:$0xff] %vm52_vm0, %v327_v35 }
 0x1d5   :  { %v323_v38 = vadd.f32 %v407_v37, %v359_v30  ;;  %v317_v39 = vpop.f32.mrb[3].mxu1  ;;  %330 = vst.msk [vmem:[#allocation4] sm:$0xff] %vm52_vm0, %v326_v36 }
 0x1d6   :  { %v318_v40 = vadd.f32 %v359_v30, %v317_v39 }
 0x1d7   :  { %v329_v41 = vmax.f32 %v323_v38, 0.0 }
 0x1d8   :  { %v328_v42 = vmax.f32 %v318_v40, 0.0 }
 0x1d9   :  { %333 = vst.msk [vmem:[#allocation4 + $0x18] sm:$0xff] %vm52_vm0, %v329_v41 }
 0x1da   :  { %332 = vst.msk [vmem:[#allocation4 + $0x10] sm:$0xff] %vm52_vm0, %v328_v42 }
 0x1db   :  { %438 = shalt.err (!%p435_p4)
}
 0x1dc   :  { %s439_s26 = scalar_lea.hbm %s570_s3, 512 }
 0x1dd   :  { %p440_p5 = scmp.ne.s32.totalorder %s570_s3, %s439_s26  ;;  %p443_p6 = scmp.lt.u32.totalorder %s439_s26, %s570_s3 }
 0x1df   :  { %p445_p7 = pnand %p443_p6, %p440_p5 }
 0x1e1   :  { %448 = shalt.err (!%p445_p7)
}
 0x1e2   :  { %s452_s5 = smov 128   ;;  %s453_s6 = smov 8  }
 0x1e3   :  { %345 = dma.vmem_to_hbm [thread:$0]  %s340_s23, 512, %s570_s3, [#allocation5], %s452_s5, %s452_s5, %s453_s6  }
 0x1e4   :  { %449 = dma.done.wait [#allocation5], 512  }
 0x1e5   :  { %450 = vsyncadd [#allocation5], 4294966784 }
 0x1e6   :  { %353 = vsyncpa [#allocation5], 1 }

</bundles_post_ra>
